<compile_context>
chip_gen: v5e
topology: v5e:2x2
jax: 0.10.0
libtpu: 0.0.40
codegen_flags: <defaults>
</compile_context>

<pallas_src>
import jax
import jax.numpy as jnp
from jax.experimental import pallas as pl
from jax.experimental.pallas import tpu as pltpu

_MiB = 1024 * 1024


def _round_up(x, m):
    return ((x + m - 1) // m) * m


def _gelu_tanh(x):
    # TODO(synk): PyTorch F.gelu defaults to the exact erf formulation; tanh
    # approximation is used here (|diff| < ~3e-3) since erf lowering on Mosaic
    # is not guaranteed across chip generations.
    c = jnp.float32(0.7978845608028654)  # sqrt(2/pi)
    return 0.5 * x * (1.0 + jnp.tanh(c * (x + 0.044715 * (x * x * x))))


def _geglu_kernel(x_ref, wg_ref, bg_ref, wu_ref, bu_ref, wd_ref, bd_ref, o_ref, acc_ref):
    """One (sub-model j, row-tile r, I-chunk k) grid point of the GeGLU MLP.

    x_ref  : (TR, D)      activation rows for this sub-model / row tile
    wg_ref : (D, TK)      gate-weight I-chunk           bg_ref: (1, TK)
    wu_ref : (D, TK)      up-weight   I-chunk           bu_ref: (1, TK)
    wd_ref : (TK, D)      down-weight I-chunk           bd_ref: (1, D)
    o_ref  : (TR, D)      output tile (written only on the last k)
    acc_ref: (TR, D) f32  accumulator over the I (k) axis
    """
    k = pl.program_id(2)

    @pl.when(k == 0)
    def _():
        acc_ref[...] = jnp.zeros_like(acc_ref)

    x = x_ref[...]
    gate = jnp.dot(x, wg_ref[...], preferred_element_type=jnp.float32)
    gate = gate + bg_ref[...].astype(jnp.float32)
    up = jnp.dot(x, wu_ref[...], preferred_element_type=jnp.float32)
    up = up + bu_ref[...].astype(jnp.float32)
    fuse = _gelu_tanh(gate) * up
    acc_ref[...] += jnp.dot(fuse.astype(wd_ref.dtype), wd_ref[...],
                            preferred_element_type=jnp.float32)

    @pl.when(k == pl.num_programs(2) - 1)
    def _():
        o_ref[...] = (acc_ref[...] + bd_ref[...].astype(jnp.float32)).astype(o_ref.dtype)


def _vmem_capacity_bytes():
    """Per-core VMEM capacity; conservative 64 MiB (v7x per-TC) if query fails."""
    try:
        info = pltpu.get_tpu_info()
        cap = getattr(info, "vmem_capacity_bytes", None)
        if cap:
            return int(cap)
    except Exception:
        pass
    return 64 * _MiB


def _fits(tr, tk, d, x_its, w_its, budget):
    """Conservative per-step VMEM estimate for a (tr, tk) tiling."""
    weights = 2 * 3 * d * tk * w_its          # Wgate/Wup/Wdown chunks, double-buffered
    biases = 2 * (2 * tk + d) * w_its
    io = 2 * 2 * tr * d * x_its               # x in + out tile, double-buffered
    acc = tr * d * 4                          # f32 accumulator scratch
    inter = 4 * tr * tk * 4                   # gate/up/fuse f32 intermediates
    return weights + biases + io + acc + inter <= budget


def _pick_tiles(n_rows, d, i_dim, x_its, w_its, budget):
    """Pick (row_tile, I_chunk): maximize the row tile first (weights are re-streamed
    once per row tile), then the I chunk. Row tile aligned to sublane packing."""
    sub = {4: 8, 2: 16, 1: 32}.get(x_its, 8)
    max_tr = max(sub, _round_up(min(n_rows, 1024), sub))
    tr_cands = sorted({min(t, max_tr) for t in (1024, 512, 256, 128, 64, 32, 16, 8)
                       if min(t, max_tr) % sub == 0}, reverse=True)
    tk_cands = [i_dim] + [c for c in (2048, 1024, 512, 256, 128)
                          if c < i_dim and i_dim % c == 0]
    for tr in tr_cands:
        for tk in tk_cands:
            if _fits(tr, tk, d, x_its, w_its, budget):
                return tr, tk
    return tr_cands[-1], tk_cands[-1]


def _direct_ok(d, tk, hidden, inter):
    """True if (d, tk) splice blocks of the original parameter matrices satisfy the
    (8,128) BlockSpec tiling constraint (so no wrapper-side weight copy is needed)."""
    lane_i = (tk % 128 == 0) or (tk == inter)
    sub_i = (tk % 8 == 0) or (tk == inter)
    lane_d = (d % 128 == 0) or (d == hidden)
    sub_d = (d % 8 == 0) or (d == hidden)
    return lane_i and sub_i and lane_d and sub_d


def _mlp_forward_group(xs, models, params):
    """Fused GeGLU MLP for a group of same-shaped inputs (one fractal level)."""
    m = len(xs)
    b, t, d = xs[0].shape
    n = b * t
    hidden, inter = params["Wgate"].shape
    mult = inter // hidden
    i_dim = d * mult

    x_dtype = xs[0].dtype
    w_its = params["Wgate"].dtype.itemsize

    cap = _vmem_capacity_bytes()
    vmem_limit = max(min(cap - 16 * _MiB, 112 * _MiB), 32 * _MiB)
    budget = max(vmem_limit - 8 * _MiB, 16 * _MiB)

    tr, tk = _pick_tiles(n, d, i_dim, x_dtype.itemsize, w_its, budget)
    ki = i_dim // tk

    # Activations: stack sub-models, pad rows to a multiple of the row tile.
    x_st = jnp.stack([x.reshape(n, d) for x in xs])
    n_pad = _round_up(n, tr)
    if n_pad != n:
        x_st = jnp.pad(x_st, ((0, 0), (0, n_pad - n), (0, 0)))

    contiguous = all(models[p] == models[0] + p for p in range(m))
    off = models[0]
    direct = contiguous and _direct_ok(d, tk, hidden, inter)

    x_spec = pl.BlockSpec((None, tr, d), lambda j, r, k: (j, r, 0))
    o_spec = pl.BlockSpec((None, tr, d), lambda j, r, k: (j, r, 0))

    if direct:
        # Stream the spliced diagonal blocks directly out of the original parameters.
        in_specs = [
            x_spec,
            pl.BlockSpec((d, tk), lambda j, r, k: (j + off, (j + off) * ki + k)),
            pl.BlockSpec((1, tk), lambda j, r, k: (0, (j + off) * ki + k)),
            pl.BlockSpec((d, tk), lambda j, r, k: (j + off, (j + off) * ki + k)),
            pl.BlockSpec((1, tk), lambda j, r, k: (0, (j + off) * ki + k)),
            pl.BlockSpec((tk, d), lambda j, r, k: ((j + off) * ki + k, j + off)),
            pl.BlockSpec((1, d), lambda j, r, k: (0, j + off)),
        ]
        w_args = (params["Wgate"], params["Bgate"].reshape(1, inter),
                  params["Wup"], params["Bup"].reshape(1, inter),
                  params["Wdown"], params["Bdown"].reshape(1, hidden))
    else:
        # Sub-model width not (8,128)-tileable against the full matrices (tiny fractal
        # levels): splice & stack the diagonal blocks once per call so BlockSpec last
        # dims equal the full (stacked) array dims.
        def spl(mdl):
            ds, isk = mdl * d, mdl * i_dim
            return (params["Wgate"][ds:ds + d, isk:isk + i_dim],
                    params["Bgate"][isk:isk + i_dim][None, :],
                    params["Wup"][ds:ds + d, isk:isk + i_dim],
                    params["Bup"][isk:isk + i_dim][None, :],
                    params["Wdown"][isk:isk + i_dim, ds:ds + d],
                    params["Bdown"][ds:ds + d][None, :])
        parts = [spl(mdl) for mdl in models]
        w_args = tuple(jnp.stack([p[q] for p in parts]) for q in range(6))
        in_specs = [
            x_spec,
            pl.BlockSpec((None, d, tk), lambda j, r, k: (j, 0, k)),
            pl.BlockSpec((None, 1, tk), lambda j, r, k: (j, 0, k)),
            pl.BlockSpec((None, d, tk), lambda j, r, k: (j, 0, k)),
            pl.BlockSpec((None, 1, tk), lambda j, r, k: (j, 0, k)),
            pl.BlockSpec((None, tk, d), lambda j, r, k: (j, k, 0)),
            pl.BlockSpec((None, 1, d), lambda j, r, k: (j, 0, 0)),
        ]

    out = pl.pallas_call(
        _geglu_kernel,
        out_shape=jax.ShapeDtypeStruct((m, n_pad, d), x_dtype),
        grid_spec=pltpu.PrefetchScalarGridSpec(
            num_scalar_prefetch=0,
            grid=(m, n_pad // tr, ki),
            in_specs=in_specs,
            out_specs=o_spec,
            scratch_shapes=[pltpu.VMEM((tr, d), jnp.float32)],
        ),
        compiler_params=pltpu.CompilerParams(
            dimension_semantics=("parallel", "parallel", "arbitrary"),
            vmem_limit_bytes=int(vmem_limit),
        ),
    )(x_st, *w_args)

    out = out[:, :n, :]
    return tuple(out[j].reshape(b, t, d) for j in range(m))


def mlp_forward(x, params, model=0, drop_bool=True):
    """JAX/Pallas equivalent of MLP.forward().

    x: either a single array (B, T, d)  -> forwardTensor(x, model)
       or a tuple of tuples of arrays   -> forwardTuple(x)
    """
    if isinstance(x, tuple):
        # TODO(synk): nn.Dropout(p=0.1) used in forwardTuple during training is not
        # implemented (eval-mode / identity behavior).
        out = ()
        for level in x:
            level_out = _mlp_forward_group(list(level), list(range(len(level))), params)
            out += (level_out,)
        return out
    return _mlp_forward_group([x], [model], params)[0]


def _reference_forward_tensor(x, params, model=0):
    """Pure-JAX reference of MLP.forwardTensor (same gelu formulation)."""
    d = x.shape[-1]
    hidden, inter = params["Wgate"].shape
    mult = inter // hidden
    i_dim = d * mult
    ds, isk = model * d, model * i_dim
    xf = x.astype(jnp.float32)
    wg = params["Wgate"][ds:ds + d, isk:isk + i_dim].astype(jnp.float32)
    bg = params["Bgate"][isk:isk + i_dim].astype(jnp.float32)
    wu = params["Wup"][ds:ds + d, isk:isk + i_dim].astype(jnp.float32)
    bu = params["Bup"][isk:isk + i_dim].astype(jnp.float32)
    wd = params["Wdown"][isk:isk + i_dim, ds:ds + d].astype(jnp.float32)
    bd = params["Bdown"][ds:ds + d].astype(jnp.float32)
    gate = _gelu_tanh(xf @ wg + bg)
    up = xf @ wu + bu
    return ((gate * up) @ wd + bd).astype(x.dtype)


if __name__ == "__main__":
    HIDDEN, INTER = 32, 64      # intermediate_multiplier = 2
    BATCH, SEQ = 2, 8

    key = jax.random.PRNGKey(0)
    kwg, kbg, kwu, kbu, kwd, kbd, kx0, kx1, kx2 = jax.random.split(key, 9)

    lim_gu = 1.0 / (HIDDEN ** 0.5)
    lim_dn = 1.0 / (INTER ** 0.5)
    params = dict(
        Wgate=jax.random.uniform(kwg, (HIDDEN, INTER), jnp.float32, -lim_gu, lim_gu),
        Bgate=jax.random.uniform(kbg, (INTER,), jnp.float32, -lim_gu, lim_gu),
        Wup=jax.random.uniform(kwu, (HIDDEN, INTER), jnp.float32, -lim_gu, lim_gu),
        Bup=jax.random.uniform(kbu, (INTER,), jnp.float32, -lim_gu, lim_gu),
        Wdown=jax.random.uniform(kwd, (INTER, HIDDEN), jnp.float32, -lim_dn, lim_dn),
        Bdown=jax.random.uniform(kbd, (HIDDEN,), jnp.float32, -lim_dn, lim_dn),
    )

    # Fractal (tuple-of-tuples) input: level 0 = 1 model @ d=32, level 1 = 2 models @ d=16.
    x_tuple = (
        (jax.random.normal(kx0, (BATCH, SEQ, HIDDEN), jnp.float32),),
        (
            jax.random.normal(kx1, (BATCH, SEQ, HIDDEN // 2), jnp.float32),
            jax.random.normal(kx2, (BATCH, SEQ, HIDDEN // 2), jnp.float32),
        ),
    )

    # forwardTuple path (one fused pallas_call per fractal level).
    out = mlp_forward(x_tuple, params, drop_bool=False)
    out = jax.block_until_ready(out)

    # forwardTensor path (single tensor, model=1 splice).
    y = mlp_forward(x_tuple[1][1], params, model=1)
    y = jax.block_until_ready(y)

    # Correctness vs pure-JAX reference.
    for i, level in enumerate(x_tuple):
        for j, xin in enumerate(level):
            ref = _reference_forward_tensor(xin, params, model=j)
            assert jnp.allclose(out[i][j], ref, rtol=1e-5, atol=1e-5), (i, j)
    ref_y = _reference_forward_tensor(x_tuple[1][1], params, model=1)
    assert jnp.allclose(y, ref_y, rtol=1e-5, atol=1e-5)

    print("KERNEL_OK")
</pallas_src>

<mosaic_0001>
module attributes {stable_mosaic.version = 11 : i64} {
  func.func @_geglu_kernel(%arg0: i32, %arg1: i32, %arg2: i32, %arg3: memref<1x16x32xf32, #tpu.memory_space<vmem>>, %arg4: memref<32x64xf32, #tpu.memory_space<vmem>>, %arg5: memref<1x64xf32, #tpu.memory_space<vmem>>, %arg6: memref<32x64xf32, #tpu.memory_space<vmem>>, %arg7: memref<1x64xf32, #tpu.memory_space<vmem>>, %arg8: memref<64x32xf32, #tpu.memory_space<vmem>>, %arg9: memref<1x32xf32, #tpu.memory_space<vmem>>, %arg10: memref<1x16x32xf32, #tpu.memory_space<vmem>>, %arg11: memref<16x32xf32, #tpu.memory_space<vmem>>) attributes {dimension_semantics = [#tpu.dimension_semantics<parallel>, #tpu.dimension_semantics<parallel>, #tpu.dimension_semantics<arbitrary>], iteration_bounds = array<i64: 1, 1, 1>, scalar_prefetch = 0 : i64, scratch_operands = 1 : i64, tpu.core_type = #tpu.core_type<tc>, window_params = [{transform_indices = @transform_0, window_bounds = array<i64: 1, 16, 32>}, {transform_indices = @transform_1, window_bounds = array<i64: 32, 64>}, {transform_indices = @transform_2, window_bounds = array<i64: 1, 64>}, {transform_indices = @transform_3, window_bounds = array<i64: 32, 64>}, {transform_indices = @transform_4, window_bounds = array<i64: 1, 64>}, {transform_indices = @transform_5, window_bounds = array<i64: 64, 32>}, {transform_indices = @transform_6, window_bounds = array<i64: 1, 32>}, {transform_indices = @transform_7, window_bounds = array<i64: 1, 16, 32>}]} {
    %c0_i32 = arith.constant 0 : i32
    %0 = arith.cmpi eq, %arg2, %c0_i32 : i32
    %1 = arith.extui %0 : i1 to i32
    %c0_i32_0 = arith.constant 0 : i32
    %2 = arith.cmpi ne, %1, %c0_i32_0 : i32
    scf.if %2 {
      %cst_25 = arith.constant 0.000000e+00 : f32
      %37 = vector.broadcast %cst_25 : f32 to vector<16x32xf32>
      %c0_26 = arith.constant 0 : index
      %c0_27 = arith.constant 0 : index
      %38 = vector.load %arg11[%c0_26, %c0_27] : memref<16x32xf32, #tpu.memory_space<vmem>>, vector<16x32xf32>
      tpu.vector_store %arg11[%c0_26, %c0_27], %37 {strides = array<i32>} : memref<16x32xf32, #tpu.memory_space<vmem>>, vector<16x32xf32>,
    } else {
    }
    %c0 = arith.constant 0 : index
    %c0_1 = arith.constant 0 : index
    %c0_2 = arith.constant 0 : index
    %3 = vector.load %arg3[%c0, %c0_1, %c0_2] : memref<1x16x32xf32, #tpu.memory_space<vmem>>, vector<1x16x32xf32>
    %4 = vector.shape_cast %3 : vector<1x16x32xf32> to vector<16x32xf32>
    %c0_3 = arith.constant 0 : index
    %c0_4 = arith.constant 0 : index
    %5 = vector.load %arg4[%c0_3, %c0_4] : memref<32x64xf32, #tpu.memory_space<vmem>>, vector<32x64xf32>
    %cst = arith.constant dense<0.000000e+00> : vector<16x64xf32>
    %6 = tpu.matmul %4, %5, %cst {dimension_numbers = #tpu.dot_dimension_numbers<[1], [0], [0], [1], [0, 0, 1, 1], [], []>} : vector<16x32xf32>, vector<32x64xf32>, vector<16x64xf32> -> vector<16x64xf32>
    %c0_5 = arith.constant 0 : index
    %c0_6 = arith.constant 0 : index
    %7 = vector.load %arg5[%c0_5, %c0_6] : memref<1x64xf32, #tpu.memory_space<vmem>>, vector<1x64xf32>
    %8 = vector.broadcast %7 : vector<1x64xf32> to vector<16x64xf32>
    %9 = arith.addf %6, %8 : vector<16x64xf32>
    %c0_7 = arith.constant 0 : index
    %c0_8 = arith.constant 0 : index
    %10 = vector.load %arg6[%c0_7, %c0_8] : memref<32x64xf32, #tpu.memory_space<vmem>>, vector<32x64xf32>
    %cst_9 = arith.constant dense<0.000000e+00> : vector<16x64xf32>
    %11 = tpu.matmul %4, %10, %cst_9 {dimension_numbers = #tpu.dot_dimension_numbers<[1], [0], [0], [1], [0, 0, 1, 1], [], []>} : vector<16x32xf32>, vector<32x64xf32>, vector<16x64xf32> -> vector<16x64xf32>
    %c0_10 = arith.constant 0 : index
    %c0_11 = arith.constant 0 : index
    %12 = vector.load %arg7[%c0_10, %c0_11] : memref<1x64xf32, #tpu.memory_space<vmem>>, vector<1x64xf32>
    %13 = vector.broadcast %12 : vector<1x64xf32> to vector<16x64xf32>
    %14 = arith.addf %11, %13 : vector<16x64xf32>
    %cst_12 = arith.constant 5.000000e-01 : f32
    %15 = vector.broadcast %cst_12 : f32 to vector<16x64xf32>
    %16 = arith.mulf %15, %9 : vector<16x64xf32>
    %17 = arith.mulf %9, %9 : vector<16x64xf32>
    %18 = arith.mulf %17, %9 : vector<16x64xf32>
    %cst_13 = arith.constant 4.471500e-02 : f32
    %19 = vector.broadcast %cst_13 : f32 to vector<16x64xf32>
    %20 = arith.mulf %19, %18 : vector<16x64xf32>
    %21 = arith.addf %9, %20 : vector<16x64xf32>
    %cst_14 = arith.constant 0.797884583 : f32
    %22 = vector.broadcast %cst_14 : f32 to vector<16x64xf32>
    %23 = arith.mulf %22, %21 : vector<16x64xf32>
    %24 = math.tanh %23 : vector<16x64xf32>
    %cst_15 = arith.constant 1.000000e+00 : f32
    %25 = vector.broadcast %cst_15 : f32 to vector<16x64xf32>
    %26 = arith.addf %25, %24 : vector<16x64xf32>
    %27 = arith.mulf %16, %26 : vector<16x64xf32>
    %28 = arith.mulf %27, %14 : vector<16x64xf32>
    %c0_16 = arith.constant 0 : index
    %c0_17 = arith.constant 0 : index
    %29 = vector.load %arg11[%c0_16, %c0_17] : memref<16x32xf32, #tpu.memory_space<vmem>>, vector<16x32xf32>
    %c0_18 = arith.constant 0 : index
    %c0_19 = arith.constant 0 : index
    %30 = vector.load %arg8[%c0_18, %c0_19] : memref<64x32xf32, #tpu.memory_space<vmem>>, vector<64x32xf32>
    %cst_20 = arith.constant dense<0.000000e+00> : vector<16x32xf32>
    %31 = tpu.matmul %28, %30, %cst_20 {dimension_numbers = #tpu.dot_dimension_numbers<[1], [0], [0], [1], [0, 0, 1, 1], [], []>} : vector<16x64xf32>, vector<64x32xf32>, vector<16x32xf32> -> vector<16x32xf32>
    %32 = arith.addf %29, %31 : vector<16x32xf32>
    %c0_21 = arith.constant 0 : index
    %c0_22 = arith.constant 0 : index
    %33 = vector.load %arg11[%c0_21, %c0_22] : memref<16x32xf32, #tpu.memory_space<vmem>>, vector<16x32xf32>
    tpu.vector_store %arg11[%c0_21, %c0_22], %32 {strides = array<i32>} : memref<16x32xf32, #tpu.memory_space<vmem>>, vector<16x32xf32>,
    %c0_i32_23 = arith.constant 0 : i32
    %34 = arith.cmpi eq, %arg2, %c0_i32_23 : i32
    %35 = arith.extui %34 : i1 to i32
    %c0_i32_24 = arith.constant 0 : i32
    %36 = arith.cmpi ne, %35, %c0_i32_24 : i32
    scf.if %36 {
      %c0_25 = arith.constant 0 : index
      %c0_26 = arith.constant 0 : index
      %37 = vector.load %arg11[%c0_25, %c0_26] : memref<16x32xf32, #tpu.memory_space<vmem>>, vector<16x32xf32>
      %c0_27 = arith.constant 0 : index
      %c0_28 = arith.constant 0 : index
      %38 = vector.load %arg9[%c0_27, %c0_28] : memref<1x32xf32, #tpu.memory_space<vmem>>, vector<1x32xf32>
      %39 = vector.broadcast %38 : vector<1x32xf32> to vector<16x32xf32>
      %40 = arith.addf %37, %39 : vector<16x32xf32>
      %c0_29 = arith.constant 0 : index
      %c0_30 = arith.constant 0 : index
      %c0_31 = arith.constant 0 : index
      %41 = vector.load %arg10[%c0_29, %c0_30, %c0_31] : memref<1x16x32xf32, #tpu.memory_space<vmem>>, vector<1x16x32xf32>
      %42 = vector.shape_cast %41 : vector<1x16x32xf32> to vector<16x32xf32>
      %43 = vector.shape_cast %40 : vector<16x32xf32> to vector<1x16x32xf32>
      tpu.vector_store %arg10[%c0_29, %c0_30, %c0_31], %43 {strides = array<i32>} : memref<1x16x32xf32, #tpu.memory_space<vmem>>, vector<1x16x32xf32>,
    } else {
    }
    return
  }
  func.func @transform_0(%arg0: i32, %arg1: i32, %arg2: i32) -> (i32, i32, i32) {
    %c0_i32 = arith.constant 0 : i32
    %c0_i32_0 = arith.constant 0 : i32
    return %arg0, %arg1, %c0_i32 : i32, i32, i32
  }
  func.func @transform_1(%arg0: i32, %arg1: i32, %arg2: i32) -> (i32, i32) {
    %c0_i32 = arith.constant 0 : i32
    %0 = arith.addi %arg0, %c0_i32 : i32
    %c0_i32_0 = arith.constant 0 : i32
    %1 = arith.addi %arg0, %c0_i32_0 : i32
    %c1_i32 = arith.constant 1 : i32
    %2 = arith.muli %1, %c1_i32 : i32
    %3 = arith.addi %2, %arg2 : i32
    %c0_i32_1 = arith.constant 0 : i32
    return %0, %3 : i32, i32
  }
  func.func @transform_2(%arg0: i32, %arg1: i32, %arg2: i32) -> (i32, i32) {
    %c0_i32 = arith.constant 0 : i32
    %0 = arith.addi %arg0, %c0_i32 : i32
    %c1_i32 = arith.constant 1 : i32
    %1 = arith.muli %0, %c1_i32 : i32
    %2 = arith.addi %1, %arg2 : i32
    %c0_i32_0 = arith.constant 0 : i32
    %c0_i32_1 = arith.constant 0 : i32
    return %c0_i32_0, %2 : i32, i32
  }
  func.func @transform_3(%arg0: i32, %arg1: i32, %arg2: i32) -> (i32, i32) {
    %c0_i32 = arith.constant 0 : i32
    %0 = arith.addi %arg0, %c0_i32 : i32
    %c0_i32_0 = arith.constant 0 : i32
    %1 = arith.addi %arg0, %c0_i32_0 : i32
    %c1_i32 = arith.constant 1 : i32
    %2 = arith.muli %1, %c1_i32 : i32
    %3 = arith.addi %2, %arg2 : i32
    %c0_i32_1 = arith.constant 0 : i32
    return %0, %3 : i32, i32
  }
  func.func @transform_4(%arg0: i32, %arg1: i32, %arg2: i32) -> (i32, i32) {
    %c0_i32 = arith.constant 0 : i32
    %0 = arith.addi %arg0, %c0_i32 : i32
    %c1_i32 = arith.constant 1 : i32
    %1 = arith.muli %0, %c1_i32 : i32
    %2 = arith.addi %1, %arg2 : i32
    %c0_i32_0 = arith.constant 0 : i32
    %c0_i32_1 = arith.constant 0 : i32
    return %c0_i32_0, %2 : i32, i32
  }
  func.func @transform_5(%arg0: i32, %arg1: i32, %arg2: i32) -> (i32, i32) {
    %c0_i32 = arith.constant 0 : i32
    %0 = arith.addi %arg0, %c0_i32 : i32
    %c1_i32 = arith.constant 1 : i32
    %1 = arith.muli %0, %c1_i32 : i32
    %2 = arith.addi %1, %arg2 : i32
    %c0_i32_0 = arith.constant 0 : i32
    %3 = arith.addi %arg0, %c0_i32_0 : i32
    %c0_i32_1 = arith.constant 0 : i32
    return %2, %3 : i32, i32
  }
  func.func @transform_6(%arg0: i32, %arg1: i32, %arg2: i32) -> (i32, i32) {
    %c0_i32 = arith.constant 0 : i32
    %0 = arith.addi %arg0, %c0_i32 : i32
    %c0_i32_0 = arith.constant 0 : i32
    %c0_i32_1 = arith.constant 0 : i32
    return %c0_i32_0, %0 : i32, i32
  }
  func.func @transform_7(%arg0: i32, %arg1: i32, %arg2: i32) -> (i32, i32, i32) {
    %c0_i32 = arith.constant 0 : i32
    %c0_i32_0 = arith.constant 0 : i32
    return %arg0, %arg1, %c0_i32 : i32, i32, i32
  }
}

</mosaic_0001>

<bundles_post_ra>
// kernel: tpu_custom_call.1
= control target key start
LH: loop header
LB: loop body
LE: loop exit
PB: predicated region body
PF: predicated region fallthrough
CT: control target
= control target key end

     0   :  { %s479_s0 = inlined_call_operand.vmem [shape: f32[1,16,32], index: 0, kind: input, shape index: {}]   ;;  %s480_s1 = inlined_call_operand.vmem [shape: f32[32,64], index: 1, kind: input, shape index: {}]   ;;  %s481_s2 = inlined_call_operand.vmem [shape: f32[1,64], index: 2, kind: input, shape index: {}]   ;;  %s482_s3 = inlined_call_operand.vmem [shape: f32[32,64], index: 3, kind: input, shape index: {}]   ;;  %s483_s4 = inlined_call_operand.vmem [shape: f32[1,64], index: 4, kind: input, shape index: {}]   ;;  %s484_s5 = inlined_call_operand.vmem [shape: f32[64,32], index: 5, kind: input, shape index: {}]   ;;  %s485_s6 = inlined_call_operand.vmem [shape: f32[1,32], index: 6, kind: input, shape index: {}]   ;;  %s486_s7 = inlined_call_operand.hbm [shape: f32[1,16,32], index: 7, kind: output, shape index: {}]  }
   0x1   :  { %v123_v0 = vld [vmem:[%s480_s1 + $0x18] sm:$0xff]  ;;  %v122_v1 = vld [vmem:[%s480_s1 + $0x10] sm:$0xff]  ;;  %v121_v2 = vld [vmem:[%s480_s1 + $0x8] sm:$0xff] }
   0x2   :  { %147 = vmatpush.msra.mxu0 %v123_v0  ;;  %v161_v3 = vld [vmem:[%s482_s3 + $0x18] sm:$0xff]  ;;  %v160_v4 = vld [vmem:[%s482_s3 + $0x10] sm:$0xff]  ;;  %v120_v5 = vld [vmem:[%s480_s1] sm:$0xff] }
   0x3   :  { %178 = vmatpush.msra.mxu1 %v161_v3  ;;  %v159_v6 = vld [vmem:[%s482_s3 + $0x8] sm:$0xff] }
   0x4   :  { %148 = vmatpush.msra.mxu0 %v122_v1 }
   0x5   :  { %12 = vsyncpa [#allocation4], 0  ;;  %vm115_vm0 = vcmask 261120   ;;  %v118_v7 = vld [vmem:[%s479_s0] sm:$0xff]  ;;  %179 = vmatpush.msra.mxu1 %v160_v4  ;;  %v119_v9 = vld [vmem:[%s479_s0 + $0x8] sm:$0xff]  ;;  %v359_v22 = vmov 0.0  }
   0x6   :  { %149 = vmatpush.msra.mxu0 %v121_v2  ;;  %v158_v8 = vld [vmem:[%s482_s3] sm:$0xff]  ;;  %v218_v10 = vld [vmem:[%s484_s5 + $0x38] sm:$0xff]  ;;  %v217_v11 = vld [vmem:[%s484_s5 + $0x30] sm:$0xff]  ;;  %116 = vst.msk [vmem:[#allocation2] sm:$0xff] %vm115_vm0, %v359_v22  ;;  %vm219_vm1 = vcmask 523264   ;;  %s360_s14 = smov [#allocation3]  }
   0x7   :  { %180 = vmatpush.msra.mxu1 %v159_v6  ;;  %234 = vmatpush.msra.mxu2 %v218_v10  ;;  %v216_v12 = vld [vmem:[%s484_s5 + $0x28] sm:$0xff]  ;;  %v215_v13 = vld [vmem:[%s484_s5 + $0x20] sm:$0xff]  ;;  %v214_v14 = vld [vmem:[%s484_s5 + $0x18] sm:$0xff]  ;;  %117 = vst.msk [vmem:[#allocation2 + $0x8] sm:$0xff] %vm115_vm0, %v359_v22  ;;  %s270_s15 = sshll.u32 %s360_s14, 4  ;;  %s272_s18 = sshll.u32 %s486_s7, 4  ;;  %s271_s15 = int_to_ptr.vmem [resolvable:$true] %s270_s15  ;;  %s273_s18 = int_to_ptr.hbm [resolvable:$true] %s272_s18 }
   0x8   :  { %150 = vmatpush.msra.mxu0 %v120_v5  ;;  %314 = vmatpush.msra.mxu3 %v218_v10  ;;  %v213_v15 = vld [vmem:[%s484_s5 + $0x10] sm:$0xff]  ;;  %v212_v16 = vld [vmem:[%s484_s5 + $0x8] sm:$0xff]  ;;  %v211_v17 = vld [vmem:[%s484_s5] sm:$0xff]  ;;  %s362_s1 = smov 8  }
   0x9   :  { %308 = vmatmul.msk.f32.vlgmr.msra.gmra.mxu0 %vm115_vm0, %v118_v7  ;;  %181 = vmatpush.msra.mxu1 %v158_v8  ;;  %v326_v18 = vld [vmem:[%s481_s2] ss:$0 sm:$0xff] }
   0xa   :  { %310 = vmatmul.msk.f32.vlgmr.msra.gmra.mxu1 %vm115_vm0, %v118_v7  ;;  %235 = vmatpush.msra.mxu2 %v217_v11  ;;  %v327_v33 = vld [vmem:[%s483_s4] ss:$0 sm:$0xff] }
   0xb   :  { %315 = vmatpush.msra.mxu3 %v217_v11  ;;  %v328_v53 = vld [vmem:[%s485_s6] ss:$0 sm:$0xff]  ;;  %s361_s6 = smov 128  }
   0xc   :  { %236 = vmatpush.msra.mxu2 %v216_v12 }
   0xd   :  { %316 = vmatpush.msra.mxu3 %v216_v12  ;;  %v209_v49 = vld [vmem:[#allocation2] sm:$0xff] }
   0xe   :  { %237 = vmatpush.msra.mxu2 %v215_v13  ;;  %v210_v52 = vld [vmem:[#allocation2 + $0x8] sm:$0xff] }
   0xf   :  { %317 = vmatpush.msra.mxu3 %v215_v13 }
  0x10   :  { %238 = vmatpush.msra.mxu2 %v214_v14 }
  0x11   :  { %309 = vmatmul.msk.f32.gmra.mxu0 %vm115_vm0, %v119_v9  ;;  %318 = vmatpush.msra.mxu3 %v214_v14 }
  0x12   :  { %311 = vmatmul.msk.f32.gmra.mxu1 %vm115_vm0, %v119_v9  ;;  %239 = vmatpush.msra.mxu2 %v213_v15 }
  0x13   :  { %319 = vmatpush.msra.mxu3 %v213_v15 }
  0x14   :  { %240 = vmatpush.msra.mxu2 %v212_v16 }
  0x15   :  { %320 = vmatpush.msra.mxu3 %v212_v16 }
  0x16   :  { %241 = vmatpush.msra.mxu2 %v211_v17 }
  0x17   :  { %321 = vmatpush.msra.mxu3 %v211_v17 }
  0x86   :  { %v152_v19 = vpop.f32.mrf.mxu0 }
  0x87   :  { %v153_v20 = vadd.f32 %v326_v18, %v152_v19  ;;  %v183_v32 = vpop.f32.mrf.mxu1 }
  0x88   :  { %v184_v37 = vadd.f32 %v327_v33, %v183_v32 }
  0x89   :  { %v191_v21 = vmul.f32 %v153_v20, %v153_v20  ;;  %v189_v38 = vmul.f32 0.5, %v153_v20 }
  0x8b   :  { %v193_v23 = vmul.f32 %v191_v21, %v153_v20 }
  0x8d   :  { %v195_v24 = vmul.f32 0.044715, %v193_v23 }
  0x8e   :  { %v155_v25 = vpop.f32.mrf.mxu0 }
  0x8f   :  { %v197_v26 = vadd.f32 %v195_v24, %v153_v20  ;;  %v156_v27 = vadd.f32 %v326_v18, %v155_v25  ;;  %v186_v42 = vpop.f32.mrf.mxu1 }
  0x90   :  { %v187_v44 = vadd.f32 %v327_v33, %v186_v42 }
  0x91   :  { %v192_v28 = vmul.f32 %v156_v27, %v156_v27  ;;  %v199_v29 = vmul.f32 0.7978846, %v197_v26  ;;  %v190_v45 = vmul.f32 0.5, %v156_v27 }
  0x93   :  { %v194_v30 = vmul.f32 %v192_v28, %v156_v27  ;;  %329 = vtanh.f32 %v199_v29 }
  0x95   :  { %v196_v31 = vmul.f32 0.044715, %v194_v30 }
  0x97   :  { %v198_v34 = vadd.f32 %v196_v31, %v156_v27 }
  0x99   :  { %v330_v35 = vpop.eup %329  ;;  %v200_v36 = vmul.f32 0.7978846, %v198_v34 }
  0x9a   :  { %v203_v39 = vadd.f32 1.0, %v330_v35 }
  0x9b   :  { %331 = vtanh.f32 %v200_v36 }
  0x9c   :  { %v205_v40 = vmul.f32 %v203_v39, %v189_v38 }
  0x9e   :  { %v207_v41 = vmul.f32 %v205_v40, %v184_v37 }
  0xa0   :  { %312 = vmatmul.msk.f32.vlgmr.msra.gmra.mxu2 %vm219_vm1, %v207_v41 }
  0xa1   :  { %v332_v43 = vpop.eup %331 }
  0xa2   :  { %v204_v46 = vadd.f32 1.0, %v332_v43 }
  0xa4   :  { %v206_v47 = vmul.f32 %v204_v46, %v190_v45 }
  0xa6   :  { %v208_v48 = vmul.f32 %v206_v47, %v187_v44 }
  0xa8   :  { %313 = vmatmul.msk.f32.vlgmr.msra.gmra.mxu3 %vm219_vm1, %v208_v48 }
 0x123   :  { %v243_v50 = vpop.f32.mrf.mxu2 }
 0x124   :  { %v249_v51 = vadd.f32 %v243_v50, %v209_v49 }
 0x126   :  { %251 = vst.msk [vmem:[#allocation2] sm:$0xff] %vm115_vm0, %v249_v51 }
 0x12b   :  { %v246_v54 = vpop.f32.mrf.mxu3 }
 0x12c   :  { %v250_v55 = vadd.f32 %v246_v54, %v210_v52 }
 0x12d   :  { %v256_v56 = vld [vmem:[#allocation2] sm:$0xff] }
 0x12e   :  { %252 = vst.msk [vmem:[#allocation2 + $0x8] sm:$0xff] %vm115_vm0, %v250_v55  ;;  %v262_v57 = vadd.f32 %v328_v53, %v256_v56 }
 0x130   :  { %264 = vst.msk [vmem:[#allocation3] sm:$0xff] %vm115_vm0, %v262_v57 }
 0x135   :  { %v257_v58 = vld [vmem:[#allocation2 + $0x8] sm:$0xff] }
 0x136   :  { %v263_v59 = vadd.f32 %v328_v53, %v257_v58 }
 0x138   :  { %265 = vst.msk [vmem:[#allocation3 + $0x8] sm:$0xff] %vm115_vm0, %v263_v59 }
 0x139   :  { %278 = dma.vmem_to_hbm [thread:$0]  %s271_s15, 256, %s273_s18, [#allocation4], %s361_s6, %s361_s6, %s362_s1  }
 0x13a   :  { %357 = dma.done.wait [#allocation4], 256  }
 0x13b   :  { %358 = vsyncadd [#allocation4], 4294967040 }
 0x13c   :  { %283 = vsyncpa [#allocation4], 1 }

</bundles_post_ra>
